<compile_context>
chip_gen: v7x
topology: tpu7x:2x2x1
jax: 0.10.0
libtpu: 0.0.40
codegen_flags: <defaults>
</compile_context>

<pallas_src>
import functools

import jax
import jax.numpy as jnp
import numpy as np
from jax.experimental import pallas as pl
from jax.experimental.pallas import tpu as pltpu

DENSE_IN = 13
DENSE_PAD = 16      # 13 features + 1 "ones" row (b1 fold) + 2 zero rows (sublane align)
HIDDEN = 256
N_SPARSE = 26
MAX_TILE_B = 2048   # sweepable up to 4096 (v6e 128 MiB VMEM); 2048 is safe on v5e/v7x


def _round_up(x, m):
    return (x + m - 1) // m * m


def _pick_tile_b(B):
    # Big tiles amortize the ~0.35 us per-grid-step overhead; keep >=4 grid steps when
    # B is large enough so dimension_semantics=("parallel",) can feed both v7x TCs.
    quarter = _round_up(max((B + 3) // 4, 1), 128)
    return int(min(MAX_TILE_B, quarter))


def criteo_kernel(xt_ref, extra_ref, w1t_ref, w2t_ref, b2_ref, w3f_ref, out_ref):
    """Transposed MLP: h1 = relu(W1t@xt)  h2 = relu(W2t@h1 + b2)  y = w3f@h2 + extra.

    xt_ref  : (16, TILE_B)  bf16, row 13 == 1.0 (b1 folded into w1t column 13)
    w1t_ref : (256, 16)     bf16   [W1^T | b1 | 0 | 0]
    w2t_ref : (256, 256)    bf16   W2^T
    b2_ref  : (256, 1)      f32
    w3f_ref : (1, 256)      bf16   (W3 @ W4y)^T  -- folded head
    extra_ref/out_ref : (1, TILE_B) f32 -- lane-dense on the batch axis
    """
    h1 = jnp.dot(w1t_ref[...], xt_ref[...],
                 preferred_element_type=jnp.float32)               # (256, TILE_B)
    h1 = jnp.maximum(h1, 0.0).astype(jnp.bfloat16)

    h2 = jnp.dot(w2t_ref[...], h1,
                 preferred_element_type=jnp.float32) + b2_ref[...]  # (256, TILE_B)
    h2 = jnp.maximum(h2, 0.0).astype(jnp.bfloat16)

    y = jnp.dot(w3f_ref[...], h2,
                preferred_element_type=jnp.float32)                 # (1, TILE_B)
    out_ref[...] = y + extra_ref[...]


def init_params(key, feature_dimension, embed_dim):
    """Synthetic parameters. Linear(in, out) stored transposed as (in, out)."""
    ks = jax.random.split(key, 9)

    def lin(kw, kb, fan_in, fan_out):
        lim = 1.0 / np.sqrt(fan_in)
        w = jax.random.uniform(kw, (fan_in, fan_out), jnp.float32, -lim, lim)
        b = jax.random.uniform(kb, (1, fan_out), jnp.float32, -lim, lim)
        return w, b

    w1, b1 = lin(ks[0], ks[1], DENSE_IN, HIDDEN)
    w2, b2 = lin(ks[2], ks[3], HIDDEN, HIDDEN)
    w3, b3 = lin(ks[4], ks[5], HIDDEN, HIDDEN)
    # w4: Linear(26*E + 256, 1); first 26*E rows see flat_embeddings, last 256 see y3
    # (matches torch.cat((flat_embeddings, y3), 1)).
    w4, b4 = lin(ks[6], ks[7], N_SPARSE * embed_dim + HIDDEN, 1)
    emb_table = jax.random.normal(ks[8], (feature_dimension, embed_dim), jnp.float32)
    return dict(w1=w1, b1=b1, w2=w2, b2=b2, w3=w3, b3=b3, w4=w4, b4=b4,
                emb_table=emb_table)


def fold_params(params, embed_dim):
    """Precompute the algebraic folds; store matmul weights transposed, in bf16."""
    ne = N_SPARSE * embed_dim
    w4_emb = params["w4"][:ne, :]                                  # (26*E, 1)
    w4_y3 = params["w4"][ne:, :]                                   # (256, 1)

    # Fold W3 into the head:  y3 @ W4y == relu2 @ (W3 @ W4y) + b3 @ W4y.
    w3f = (params["w3"] @ w4_y3).T                                 # (1, 256)
    const = (params["b3"] @ w4_y3 + params["b4"])[0, 0]            # scalar

    # Fold W4e into the embedding table: per-(position, id) scalar score.
    w4e = w4_emb[:, 0].reshape(N_SPARSE, embed_dim)                # (26, E) == nn.Flatten order
    scores = jnp.einsum("ve,pe->pv", params["emb_table"], w4e)     # (26, V)

    # Transposed W1 with b1 folded into column 13 (ones feature), columns 14-15 zero.
    w1t = jnp.concatenate(
        [params["w1"].T, params["b1"].T,
         jnp.zeros((HIDDEN, DENSE_PAD - DENSE_IN - 1), jnp.float32)], axis=1)  # (256, 16)

    return dict(w1t=w1t.astype(jnp.bfloat16),
                w2t=params["w2"].T.astype(jnp.bfloat16),           # (256, 256)
                b2=params["b2"].T.astype(jnp.float32),             # (256, 1)
                w3f=w3f.astype(jnp.bfloat16),                      # (1, 256)
                scores=scores, const=const)


@functools.partial(jax.jit, static_argnames=("tile_b",))
def criteo_forward(dense, sparse_ids, folded, tile_b=None):
    B = dense.shape[0]
    if tile_b is None:
        tile_b = _pick_tile_b(B)
    pB = _round_up(B, tile_b)
    n_tiles = pB // tile_b

    # Embedding + W4e contribution, folded to one scalar per row (XLA gather; V small).
    # TODO(synk): for huge vocabularies, move this gather in-kernel via scalar prefetch.
    gathered = jnp.take_along_axis(folded["scores"], sparse_ids.T, axis=1)   # (26, B)
    extra = gathered.sum(axis=0) + folded["const"]                           # (B,)
    extra = jnp.pad(extra, (0, pB - B)).reshape(1, pB).astype(jnp.float32)

    # Transposed, lane-dense dense input (single fused pre-pass):
    #   rows 0..12 = features, row 13 = 1.0 (b1 fold), rows 14..15 = 0; batch -> lanes.
    xt = jnp.concatenate(
        [dense.T,
         jnp.ones((1, B), dense.dtype),
         jnp.zeros((DENSE_PAD - DENSE_IN - 1, B), dense.dtype)], axis=0)     # (16, B)
    xt = jnp.pad(xt, ((0, 0), (0, pB - B))).astype(jnp.bfloat16)             # (16, pB)

    const_spec = lambda shape: pl.BlockSpec(shape, lambda i: (0, 0))   # resident weights

    flops = 2 * pB * HIDDEN * (DENSE_PAD + HIDDEN + 1)
    bytes_accessed = (xt.size * 2 + extra.size * 4 + pB * 4
                      + (HIDDEN * DENSE_PAD + HIDDEN * HIDDEN + HIDDEN) * 2 + HIDDEN * 4)

    out = pl.pallas_call(
        criteo_kernel,
        out_shape=jax.ShapeDtypeStruct((1, pB), jnp.float32),
        grid=(n_tiles,),
        in_specs=[
            pl.BlockSpec((DENSE_PAD, tile_b), lambda i: (0, i)),   # x^T tile (batch on lanes)
            pl.BlockSpec((1, tile_b), lambda i: (0, i)),           # per-row embedding scalar
            const_spec((HIDDEN, DENSE_PAD)),                       # w1t (b1 folded in)
            const_spec((HIDDEN, HIDDEN)),                          # w2t
            const_spec((HIDDEN, 1)),                               # b2 column
            const_spec((1, HIDDEN)),                               # folded head
        ],
        out_specs=pl.BlockSpec((1, tile_b), lambda i: (0, i)),     # lane-dense output
        compiler_params=pltpu.CompilerParams(
            dimension_semantics=("parallel",),                     # shard tiles on v7x TCs
            vmem_limit_bytes=32 * 1024 * 1024),                    # covers v5e 16 MiB default
        cost_estimate=pl.CostEstimate(flops=int(flops), transcendentals=0,
                                      bytes_accessed=int(bytes_accessed)),
    )(xt, extra, folded["w1t"], folded["w2t"], folded["b2"], folded["w3f"])

    return out[0, :B].reshape(B, 1)


def reference_forward_folded(dense, sparse_ids, folded):
    """Pure-JAX mirror of the kernel math (same folds + bf16 rounding)."""
    f32 = jnp.float32
    B = dense.shape[0]
    x = jnp.concatenate([dense, jnp.ones((B, 1), dense.dtype),
                         jnp.zeros((B, DENSE_PAD - DENSE_IN - 1), dense.dtype)], axis=1)
    x = x.astype(jnp.bfloat16).astype(f32)
    h1 = jnp.maximum(x @ folded["w1t"].astype(f32).T, 0.0)
    h1 = h1.astype(jnp.bfloat16).astype(f32)
    h2 = jnp.maximum(h1 @ folded["w2t"].astype(f32).T + folded["b2"].T, 0.0)
    h2 = h2.astype(jnp.bfloat16).astype(f32)
    mlp = h2 @ folded["w3f"].astype(f32).T                                   # (B, 1)
    emb = jnp.take_along_axis(folded["scores"], sparse_ids.T, axis=1).sum(axis=0)
    return mlp + emb[:, None] + folded["const"]


def reference_forward_unfolded(dense, sparse_ids, params):
    """Unfolded f32 reference of the original torch module (validates the folds)."""
    h1 = jnp.maximum(dense @ params["w1"] + params["b1"], 0.0)
    h2 = jnp.maximum(h1 @ params["w2"] + params["b2"], 0.0)
    y3 = h2 @ params["w3"] + params["b3"]
    embs = params["emb_table"][sparse_ids]                                   # (B, 26, E)
    flat = embs.reshape(embs.shape[0], -1)                                   # (B, 26*E)
    y4 = jnp.concatenate([flat, y3], axis=1)
    return y4 @ params["w4"] + params["b4"]


if __name__ == "__main__":
    key = jax.random.PRNGKey(0)
    k_params, k_dense, k_sparse = jax.random.split(key, 3)

    batch_size = 8
    embed_dim = 8
    feature_dimension = 64

    params = init_params(k_params, feature_dimension, embed_dim)
    folded = fold_params(params, embed_dim)

    dense = jax.random.normal(k_dense, (batch_size, DENSE_IN), jnp.float32)      # data[0]
    sparse_ids = jax.random.randint(k_sparse, (batch_size, N_SPARSE), 0,
                                    feature_dimension, jnp.int32)                # data[1]

    y = criteo_forward(dense, sparse_ids, folded)
    jax.block_until_ready(y)
    assert y.shape == (batch_size, 1)

    # Tight check against the folded/bf16-rounded math the kernel implements.
    y_fold = reference_forward_folded(dense, sparse_ids, folded)
    np.testing.assert_allclose(np.asarray(y), np.asarray(y_fold), rtol=1e-2, atol=1e-2)

    # Looser check against the original, unfolded f32 model (bounds fold + bf16 error).
    y_ref = reference_forward_unfolded(dense, sparse_ids, params)
    np.testing.assert_allclose(np.asarray(y), np.asarray(y_ref), rtol=6e-2, atol=6e-2)

    print("KERNEL_OK")
</pallas_src>

<mosaic_0001>
module attributes {stable_mosaic.version = 11 : i64} {
  func.func @criteo_kernel(%arg0: i32, %arg1: memref<16x128xbf16, #tpu.memory_space<vmem>>, %arg2: memref<1x128xf32, #tpu.memory_space<vmem>>, %arg3: memref<256x16xbf16, #tpu.memory_space<vmem>>, %arg4: memref<256x256xbf16, #tpu.memory_space<vmem>>, %arg5: memref<256x1xf32, #tpu.memory_space<vmem>>, %arg6: memref<1x256xbf16, #tpu.memory_space<vmem>>, %arg7: memref<1x128xf32, #tpu.memory_space<vmem>>) attributes {dimension_semantics = [#tpu.dimension_semantics<parallel>], iteration_bounds = array<i64: 1>, scalar_prefetch = 0 : i64, scratch_operands = 0 : i64, tpu.core_type = #tpu.core_type<tc>, window_params = [{transform_indices = @transform_0, window_bounds = array<i64: 16, 128>}, {transform_indices = @transform_1, window_bounds = array<i64: 1, 128>}, {pipeline_mode = #tpu.pipeline_mode<synchronous>, transform_indices = @transform_2, window_bounds = array<i64: 256, 16>}, {pipeline_mode = #tpu.pipeline_mode<synchronous>, transform_indices = @transform_3, window_bounds = array<i64: 256, 256>}, {pipeline_mode = #tpu.pipeline_mode<synchronous>, transform_indices = @transform_4, window_bounds = array<i64: 256, 1>}, {pipeline_mode = #tpu.pipeline_mode<synchronous>, transform_indices = @transform_5, window_bounds = array<i64: 1, 256>}, {transform_indices = @transform_6, window_bounds = array<i64: 1, 128>}]} {
    %c0 = arith.constant 0 : index
    %c0_0 = arith.constant 0 : index
    %0 = vector.load %arg3[%c0, %c0_0] : memref<256x16xbf16, #tpu.memory_space<vmem>>, vector<256x16xbf16>
    %c0_1 = arith.constant 0 : index
    %c0_2 = arith.constant 0 : index
    %1 = vector.load %arg1[%c0_1, %c0_2] : memref<16x128xbf16, #tpu.memory_space<vmem>>, vector<16x128xbf16>
    %cst = arith.constant dense<0.000000e+00> : vector<256x128xf32>
    %2 = tpu.matmul %0, %1, %cst {dimension_numbers = #tpu.dot_dimension_numbers<[1], [0], [0], [1], [0, 0, 1, 1], [], []>} : vector<256x16xbf16>, vector<16x128xbf16>, vector<256x128xf32> -> vector<256x128xf32>
    %cst_3 = arith.constant 0.000000e+00 : f32
    %3 = vector.broadcast %cst_3 : f32 to vector<256x128xf32>
    %4 = arith.maximumf %2, %3 : vector<256x128xf32>
    %5 = arith.truncf %4 : vector<256x128xf32> to vector<256x128xbf16>
    %c0_4 = arith.constant 0 : index
    %c0_5 = arith.constant 0 : index
    %6 = vector.load %arg4[%c0_4, %c0_5] : memref<256x256xbf16, #tpu.memory_space<vmem>>, vector<256x256xbf16>
    %cst_6 = arith.constant dense<0.000000e+00> : vector<256x128xf32>
    %7 = tpu.matmul %6, %5, %cst_6 {dimension_numbers = #tpu.dot_dimension_numbers<[1], [0], [0], [1], [0, 0, 1, 1], [], []>} : vector<256x256xbf16>, vector<256x128xbf16>, vector<256x128xf32> -> vector<256x128xf32>
    %c0_7 = arith.constant 0 : index
    %c0_8 = arith.constant 0 : index
    %8 = vector.load %arg5[%c0_7, %c0_8] : memref<256x1xf32, #tpu.memory_space<vmem>>, vector<256x1xf32>
    %9 = vector.broadcast %8 : vector<256x1xf32> to vector<256x128xf32>
    %10 = arith.addf %7, %9 : vector<256x128xf32>
    %cst_9 = arith.constant 0.000000e+00 : f32
    %11 = vector.broadcast %cst_9 : f32 to vector<256x128xf32>
    %12 = arith.maximumf %10, %11 : vector<256x128xf32>
    %13 = arith.truncf %12 : vector<256x128xf32> to vector<256x128xbf16>
    %c0_10 = arith.constant 0 : index
    %c0_11 = arith.constant 0 : index
    %14 = vector.load %arg6[%c0_10, %c0_11] : memref<1x256xbf16, #tpu.memory_space<vmem>>, vector<1x256xbf16>
    %cst_12 = arith.constant dense<0.000000e+00> : vector<1x128xf32>
    %15 = tpu.matmul %14, %13, %cst_12 {dimension_numbers = #tpu.dot_dimension_numbers<[1], [0], [0], [1], [0, 0, 1, 1], [], []>} : vector<1x256xbf16>, vector<256x128xbf16>, vector<1x128xf32> -> vector<1x128xf32>
    %c0_13 = arith.constant 0 : index
    %c0_14 = arith.constant 0 : index
    %16 = vector.load %arg2[%c0_13, %c0_14] : memref<1x128xf32, #tpu.memory_space<vmem>>, vector<1x128xf32>
    %17 = arith.addf %15, %16 : vector<1x128xf32>
    %c0_15 = arith.constant 0 : index
    %c0_16 = arith.constant 0 : index
    %18 = vector.load %arg7[%c0_15, %c0_16] : memref<1x128xf32, #tpu.memory_space<vmem>>, vector<1x128xf32>
    tpu.vector_store %arg7[%c0_15, %c0_16], %17 {strides = array<i32>} : memref<1x128xf32, #tpu.memory_space<vmem>>, vector<1x128xf32>,
    return
  }
  func.func @transform_0(%arg0: i32) -> (i32, i32) {
    %c0_i32 = arith.constant 0 : i32
    %c0_i32_0 = arith.constant 0 : i32
    return %c0_i32, %arg0 : i32, i32
  }
  func.func @transform_1(%arg0: i32) -> (i32, i32) {
    %c0_i32 = arith.constant 0 : i32
    %c0_i32_0 = arith.constant 0 : i32
    return %c0_i32, %arg0 : i32, i32
  }
  func.func @transform_2(%arg0: i32) -> (i32, i32) {
    %c0_i32 = arith.constant 0 : i32
    %c0_i32_0 = arith.constant 0 : i32
    %c0_i32_1 = arith.constant 0 : i32
    return %c0_i32, %c0_i32_0 : i32, i32
  }
  func.func @transform_3(%arg0: i32) -> (i32, i32) {
    %c0_i32 = arith.constant 0 : i32
    %c0_i32_0 = arith.constant 0 : i32
    %c0_i32_1 = arith.constant 0 : i32
    return %c0_i32, %c0_i32_0 : i32, i32
  }
  func.func @transform_4(%arg0: i32) -> (i32, i32) {
    %c0_i32 = arith.constant 0 : i32
    %c0_i32_0 = arith.constant 0 : i32
    %c0_i32_1 = arith.constant 0 : i32
    return %c0_i32, %c0_i32_0 : i32, i32
  }
  func.func @transform_5(%arg0: i32) -> (i32, i32) {
    %c0_i32 = arith.constant 0 : i32
    %c0_i32_0 = arith.constant 0 : i32
    %c0_i32_1 = arith.constant 0 : i32
    return %c0_i32, %c0_i32_0 : i32, i32
  }
  func.func @transform_6(%arg0: i32) -> (i32, i32) {
    %c0_i32 = arith.constant 0 : i32
    %c0_i32_0 = arith.constant 0 : i32
    return %c0_i32, %arg0 : i32, i32
  }
}

</mosaic_0001>

<bundles_post_ra>
// kernel: criteo_forward.1
= control target key start
LH: loop header
LB: loop body
LE: loop exit
PB: predicated region body
PF: predicated region fallthrough
CT: control target
= control target key end

     0   :  { %vm144_vm0 = vcmask 130048   ;;  %v1403_v19 = vmov 0   ;;  %s1842_s0 = inlined_call_operand.vmem [shape: bf16[16,128], index: 0, kind: input, shape index: {}]   ;;  %s1843_s2 = inlined_call_operand.vmem [shape: bf16[256,16], index: 2, kind: input, shape index: {}]   ;;  %s1844_s3 = inlined_call_operand.vmem [shape: bf16[256,256], index: 3, kind: input, shape index: {}]   ;;  %s1845_s4 = inlined_call_operand.vmem [shape: f32[256,1], index: 4, kind: input, shape index: {}]   ;;  %s1846_s5 = inlined_call_operand.vmem [shape: bf16[1,256], index: 5, kind: input, shape index: {}]   ;;  %s1847_s1 = inlined_call_operand.vmem [shape: f32[1,128], index: 1, kind: input, shape index: {}]   ;;  %s1848_s6 = inlined_call_operand.vmem [shape: f32[1,128], index: 6, kind: output, shape index: {}]  }
   0x1   :  { %v1338_v0 = vld [vmem:[%s1842_s0] sm:$0xff]   ;;  %v1340_v2 = vld [vmem:[%s1843_s2 + $0x8] sm:$0xff]   ;;  %v1341_v3 = vld [vmem:[%s1843_s2 + $0x10] sm:$0xff]   ;;  %1336 = vset.pattern.permute.xlu0 %v1403_v19  ;;  %1337 = vset.pattern.permute.xlu1 %v1403_v19 }
   0x2   :  { %v1339_v1 = vld [vmem:[%s1843_s2] sm:$0xff]   ;;  %1284 = vmatprep.subr.bf16.mxu0 %v1338_v0  ;;  %v1342_v4 = vld [vmem:[%s1843_s2 + $0x18] sm:$0xff]   ;;  %v1344_v6 = vld [vmem:[%s1843_s2 + $0x28] sm:$0xff]  }
   0x3   :  { %1285 = vmatpush3.bf16.msra.mxu0 %v1338_v0  ;;  %1286 = vmatprep.mubr.msk.bf16.mxu0 %vm144_vm0, %v1339_v1  ;;  %v1343_v5 = vld [vmem:[%s1843_s2 + $0x20] sm:$0xff]   ;;  %v1345_v7 = vld [vmem:[%s1843_s2 + $0x30] sm:$0xff]   ;;  %v1346_v8 = vld [vmem:[%s1843_s2 + $0x38] sm:$0xff]  }
   0x4   :  { %v1347_v9 = vld [vmem:[%s1843_s2 + $0x40] sm:$0xff]   ;;  %v1348_v10 = vld [vmem:[%s1843_s2 + $0x48] sm:$0xff]   ;;  %v1349_v11 = vld [vmem:[%s1843_s2 + $0x50] sm:$0xff]  }
   0x5   :  { %v1350_v12 = vld [vmem:[%s1843_s2 + $0x58] sm:$0xff]   ;;  %v1351_v13 = vld [vmem:[%s1843_s2 + $0x60] sm:$0xff]   ;;  %v1352_v14 = vld [vmem:[%s1843_s2 + $0x68] sm:$0xff]  }
   0x6   :  { %1287 = vmatmul.mubr.msk.bf16.vlgmr.msra.gmra.mrb[0].mxu0 %vm144_vm0, %v1340_v2  ;;  %v1353_v15 = vld [vmem:[%s1843_s2 + $0x70] sm:$0xff]   ;;  %v1354_v16 = vld [vmem:[%s1843_s2 + $0x78] sm:$0xff]   ;;  %v1357_v17 = vld [vmem:[%s1844_s3 + $0x4] ss:$8 sps:$4 sm:$0xff]  }
   0x7   :  { %1290 = vmatprep.mubr.msk.bf16.mxu0 %vm144_vm0, %v1341_v3  ;;  %v1360_v18 = vld [vmem:[%s1844_s3 + $0x54] ss:$8 sps:$4 sm:$0xff]   ;;  %v450_v20 = vld [vmem:[%s1845_s4 + $0x80] sm:$0xff]  ;;  %v451_v22 = vld [vmem:[%s1845_s4 + $0x88] sm:$0xff] }
   0x8   :  { %858 = vmatprep.mubr.bf16.mxu1 %v1360_v18  ;;  %v434_v21 = vld [vmem:[%s1845_s4] sm:$0xff]  ;;  %548 = vperm.xlu0 %1336, %v450_v20   ;;  %v435_v23 = vld [vmem:[%s1845_s4 + $0x8] sm:$0xff]  ;;  %v452_v24 = vld [vmem:[%s1845_s4 + $0x90] sm:$0xff] }
   0x9   :  { %468 = vperm.xlu1 %1337, %v434_v21   ;;  %v453_v25 = vld [vmem:[%s1845_s4 + $0x98] sm:$0xff]  ;;  %v436_v26 = vld [vmem:[%s1845_s4 + $0x10] sm:$0xff]  ;;  %v454_v29 = vld [vmem:[%s1845_s4 + $0xa0] sm:$0xff] }
   0xa   :  { %v437_v28 = vld [vmem:[%s1845_s4 + $0x18] sm:$0xff]  ;;  %v455_v32 = vld [vmem:[%s1845_s4 + $0xa8] sm:$0xff]  ;;  %v438_v36 = vld [vmem:[%s1845_s4 + $0x20] sm:$0xff] }
   0xb   :  { %v439_v42 = vld [vmem:[%s1845_s4 + $0x28] sm:$0xff]  ;;  %v456_v43 = vld [vmem:[%s1845_s4 + $0xb0] sm:$0xff]  ;;  %v457_v46 = vld [vmem:[%s1845_s4 + $0xb8] sm:$0xff] }
   0xc   :  { %553 = vperm.xlu0 %1336, %v451_v22   ;;  %v440_v50 = vld [vmem:[%s1845_s4 + $0x30] sm:$0xff]  ;;  %v441_v56 = vld [vmem:[%s1845_s4 + $0x38] sm:$0xff]  ;;  %v458_v57 = vld [vmem:[%s1845_s4 + $0xc0] sm:$0xff] }
   0xd   :  { %473 = vperm.xlu1 %1337, %v435_v23   ;;  %v459_v60 = vld [vmem:[%s1845_s4 + $0xc8] sm:$0xff]  ;;  %v442_v0 = vld [vmem:[%s1845_s4 + $0x40] sm:$0xff]  ;;  %v445_v19 = vld [vmem:[%s1845_s4 + $0x58] sm:$0xff] }
   0xe   :  { %1291 = vmatmul.mubr.msk.bf16.gmra.mrb[4].mxu0 %vm144_vm0, %v1342_v4  ;;  %v462_v20 = vld [vmem:[%s1845_s4 + $0xe0] sm:$0xff] }
   0xf   :  { %1294 = vmatprep.mubr.msk.bf16.mxu0 %vm144_vm0, %v1343_v5 }
  0x10   :  { %558 = vperm.xlu0 %1336, %v452_v24   ;;  %v463_v24 = vld [vmem:[%s1845_s4 + $0xe8] sm:$0xff] }
  0x11   :  { %563 = vperm.xlu1 %1337, %v453_v25  }
  0x14   :  { %478 = vperm.xlu0 %1336, %v436_v26  }
  0x15   :  { %483 = vperm.xlu1 %1337, %v437_v28   ;;  %v446_v28 = vld [vmem:[%s1845_s4 + $0x60] sm:$0xff] }
  0x16   :  { %1295 = vmatmul.mubr.msk.bf16.gmra.mrb[8].mxu0 %vm144_vm0, %v1344_v6  ;;  %v443_v6 = vld [vmem:[%s1845_s4 + $0x48] sm:$0xff] }
  0x17   :  { %1298 = vmatprep.mubr.msk.bf16.mxu0 %vm144_vm0, %v1345_v7  ;;  %v460_v7 = vld [vmem:[%s1845_s4 + $0xd0] sm:$0xff] }
  0x18   :  { %568 = vperm.xlu0 %1336, %v454_v29  }
  0x19   :  { %573 = vperm.xlu1 %1337, %v455_v32  }
  0x1c   :  { %488 = vperm.xlu0 %1336, %v438_v36  }
  0x1d   :  { %493 = vperm.xlu1 %1337, %v439_v42  }
  0x1e   :  { %1299 = vmatmul.mubr.msk.bf16.gmra.mrb[12].mxu0 %vm144_vm0, %v1346_v8 }
  0x1f   :  { %1302 = vmatprep.mubr.msk.bf16.mxu0 %vm144_vm0, %v1347_v9 }
  0x20   :  { %578 = vperm.xlu0 %1336, %v456_v43  }
  0x21   :  { %583 = vperm.xlu1 %1337, %v457_v46   ;;  %v448_v46 = vld [vmem:[%s1845_s4 + $0x70] sm:$0xff] }
  0x24   :  { %498 = vperm.xlu0 %1336, %v440_v50  }
  0x25   :  { %503 = vperm.xlu1 %1337, %v441_v56  }
  0x26   :  { %1303 = vmatmul.mubr.msk.bf16.gmra.mrb[16].mxu0 %vm144_vm0, %v1348_v10  ;;  %v461_v10 = vld [vmem:[%s1845_s4 + $0xd8] sm:$0xff] }
  0x27   :  { %1306 = vmatprep.mubr.msk.bf16.mxu0 %vm144_vm0, %v1349_v11 }
  0x28   :  { %588 = vperm.xlu0 %1336, %v458_v57  }
  0x29   :  { %593 = vperm.xlu1 %1337, %v459_v60  }
  0x2c   :  { %508 = vperm.xlu0 %1336, %v442_v0  }
  0x2d   :  { %513 = vperm.xlu1 %1337, %v443_v6   ;;  %v1358_v6 = vld [vmem:[%s1844_s3 + $0x50] ss:$8 sps:$4 sm:$0xff]  }
  0x2e   :  { %1307 = vmatmul.mubr.msk.bf16.gmra.mrb[20].mxu0 %vm144_vm0, %v1350_v12 }
  0x2f   :  { %1310 = vmatprep.mubr.msk.bf16.mxu0 %vm144_vm0, %v1351_v13 }
  0x30   :  { %598 = vperm.xlu0 %1336, %v460_v7   ;;  %v1363_v7 = vld [vmem:[%s1844_s3 + $0x64] ss:$8 sps:$4 sm:$0xff]  }
  0x31   :  { %603 = vperm.xlu1 %1337, %v461_v10   ;;  %v1367_v10 = vld [vmem:[%s1844_s3 + $0x24] ss:$8 sps:$4 sm:$0xff]  }
  0x35   :  { %523 = vperm.xlu1 %1337, %v445_v19   ;;  %v1381_v19 = vld [vmem:[%s1844_s3 + $0x94] ss:$8 sps:$4 sm:$0xff]  }
  0x36   :  { %1311 = vmatmul.mubr.msk.bf16.gmra.mrb[24].mxu0 %vm144_vm0, %v1352_v14  ;;  %v444_v14 = vld [vmem:[%s1845_s4 + $0x50] sm:$0xff] }
  0x37   :  { %1314 = vmatprep.mubr.msk.bf16.mxu0 %vm144_vm0, %v1353_v15  ;;  %518 = vperm.xlu0 %1336, %v444_v14   ;;  %v1373_v14 = vld [vmem:[%s1844_s3 + $0x34] ss:$8 sps:$4 sm:$0xff]  }
  0x39   :  { %613 = vperm.xlu1 %1337, %v463_v24   ;;  %v1388_v24 = vld [vmem:[%s1844_s3 + $0xb4] ss:$8 sps:$4 sm:$0xff]  }
  0x3b   :  { %608 = vperm.xlu0 %1336, %v462_v20   ;;  %v1383_v20 = vld [vmem:[%s1844_s3 + $0x40] ss:$8 sps:$4 sm:$0xff]  }
  0x3e   :  { %1315 = vmatmul.mubr.msk.bf16.gmra.mrb[28].mxu0 %vm144_vm0, %v1354_v16 }
  0x3f   :  { %818 = vmatprep.mubr.bf16.mxu0 %v1357_v17  ;;  %528 = vperm.xlu0 %1336, %v446_v28   ;;  %v1394_v28 = vld [vmem:[%s1844_s3 + $0xd4] ss:$8 sps:$4 sm:$0xff]  }
  0xd9   :  { %v1288_v27 = vpop.f32.mrb[0].mxu0 }
  0xda   :  { %v227_v30 = vpop.f32.mrb[1].mxu0  ;;  %v356_v33 = vmax.f32 %v1288_v27, 0.0 }
  0xdb   :  { %v1289_v31 = vpop.f32.mrb[2].mxu0  ;;  %v354_v37 = vmax.f32 %v227_v30, 0.0 }
  0xdc   :  { %v357_v34 = vmax.f32 %v1289_v31, 0.0  ;;  %v230_v35 = vpop.f32.mrb[3].mxu0 }
  0xdd   :  { %v355_v38 = vmax.f32 %v230_v35, 0.0  ;;  %v464_v35 = vld [vmem:[%s1845_s4 + $0xf0] sm:$0xff] }
  0xde   :  { %v1546_v39 = vpack.c.bf16 %v357_v34, %v356_v33  ;;  %v447_v34 = vld [vmem:[%s1845_s4 + $0x68] sm:$0xff]  ;;  %618 = vperm.xlu0 %1336, %v464_v35   ;;  %v469_v35 = vpop.permute.xlu1 %468 }
  0xdf   :  { %v1548_v40 = vpack.c.bf16 %v355_v38, %v354_v37  ;;  %533 = vperm.xlu1 %1337, %v447_v34   ;;  %v1731_v34 = vpop.permute.xlu0 %548 }
  0xe1   :  { %v1292_v41 = vpop.f32.mrb[4].mxu0 }
  0xe2   :  { %v243_v44 = vpop.f32.mrb[5].mxu0  ;;  %v360_v47 = vmax.f32 %v1292_v41, 0.0  ;;  %538 = vperm.xlu0 %1336, %v448_v46  }
  0xe3   :  { %v1293_v45 = vpop.f32.mrb[6].mxu0  ;;  %v358_v51 = vmax.f32 %v243_v44, 0.0 }
  0xe4   :  { %v361_v48 = vmax.f32 %v1293_v45, 0.0  ;;  %v246_v49 = vpop.f32.mrb[7].mxu0  ;;  %v465_v45 = vld [vmem:[%s1845_s4 + $0xf8] sm:$0xff] }
  0xe5   :  { %v359_v52 = vmax.f32 %v246_v49, 0.0  ;;  %623 = vperm.xlu1 %1337, %v465_v45   ;;  %v449_v49 = vld [vmem:[%s1845_s4 + $0x78] sm:$0xff] }
  0xe6   :  { %v1562_v53 = vpack.c.bf16 %v361_v48, %v360_v47 }
  0xe7   :  { %v1564_v54 = vpack.c.bf16 %v359_v52, %v358_v51 }
  0xe9   :  { %v1296_v55 = vpop.f32.mrb[8].mxu0  ;;  %543 = vperm.xlu1 %1337, %v449_v49   ;;  %v1404_v49 = vmov 1966171168  }
  0xea   :  { %v259_v58 = vpop.f32.mrb[9].mxu0  ;;  %v364_v61 = vmax.f32 %v1296_v55, 0.0 }
  0xeb   :  { %v1297_v59 = vpop.f32.mrb[10].mxu0  ;;  %v362_v1 = vmax.f32 %v259_v58, 0.0 }
  0xec   :  { %v365_v62 = vmax.f32 %v1297_v59, 0.0  ;;  %v262_v63 = vpop.f32.mrb[11].mxu0 }
  0xed   :  { %v363_v2 = vmax.f32 %v262_v63, 0.0 }
  0xee   :  { %v1578_v3 = vpack.c.bf16 %v365_v62, %v364_v61 }
  0xef   :  { %v1580_v4 = vpack.c.bf16 %v363_v2, %v362_v1 }
  0xf1   :  { %v1300_v5 = vpop.f32.mrb[12].mxu0 }
  0xf2   :  { %v275_v8 = vpop.f32.mrb[13].mxu0  ;;  %v368_v11 = vmax.f32 %v1300_v5, 0.0 }
  0xf3   :  { %v1301_v9 = vpop.f32.mrb[14].mxu0  ;;  %v366_v15 = vmax.f32 %v275_v8, 0.0  ;;  %v1365_v8 = vld [vmem:[%s1844_s3 + $0x10] ss:$8 sps:$4 sm:$0xff]  }
  0xf4   :  { %v369_v12 = vmax.f32 %v1301_v9, 0.0  ;;  %v278_v13 = vpop.f32.mrb[15].mxu0  ;;  %v1366_v9 = vld [vmem:[%s1844_s3 + $0x60] ss:$8 sps:$4 sm:$0xff]  }
  0xf5   :  { %v367_v16 = vmax.f32 %v278_v13, 0.0  ;;  %v1372_v13 = vld [vmem:[%s1844_s3 + $0x70] ss:$8 sps:$4 sm:$0xff]  }
  0xf6   :  { %v1594_v17 = vpack.c.bf16 %v369_v12, %v368_v11  ;;  %v1369_v11 = vld [vmem:[%s1844_s3 + $0x74] ss:$8 sps:$4 sm:$0xff]   ;;  %v1371_v12 = vld [vmem:[%s1844_s3 + $0x20] ss:$8 sps:$4 sm:$0xff]  }
  0xf7   :  { %v1596_v18 = vpack.c.bf16 %v367_v16, %v366_v15  ;;  %v1375_v15 = vld [vmem:[%s1844_s3 + $0x84] ss:$8 sps:$4 sm:$0xff]   ;;  %v1377_v16 = vld [vmem:[%s1844_s3 + $0x30] ss:$8 sps:$4 sm:$0xff]  }
  0xf9   :  { %v1304_v21 = vpop.f32.mrb[16].mxu0 }
  0xfa   :  { %v291_v22 = vpop.f32.mrb[17].mxu0  ;;  %v372_v25 = vmax.f32 %v1304_v21, 0.0  ;;  %v1384_v21 = vld [vmem:[%s1844_s3 + $0x90] ss:$8 sps:$4 sm:$0xff]  }
  0xfb   :  { %v1305_v23 = vpop.f32.mrb[18].mxu0  ;;  %v370_v29 = vmax.f32 %v291_v22, 0.0  ;;  %v1385_v22 = vld [vmem:[%s1844_s3 + $0xa4] ss:$8 sps:$4 sm:$0xff]  }
  0xfc   :  { %v373_v26 = vmax.f32 %v1305_v23, 0.0  ;;  %v294_v27 = vpop.f32.mrb[19].mxu0  ;;  %v1387_v23 = vld [vmem:[%s1844_s3 + $0xa0] ss:$8 sps:$4 sm:$0xff]  }
  0xfd   :  { %v371_v30 = vmax.f32 %v294_v27, 0.0  ;;  %v1393_v27 = vld [vmem:[%s1844_s3 + $0xc0] ss:$8 sps:$4 sm:$0xff]  }
  0xfe   :  { %v395_v31 = vpack.c.bf16 %v373_v26, %v372_v25  ;;  %v1390_v25 = vld [vmem:[%s1844_s3 + $0xb0] ss:$8 sps:$4 sm:$0xff]   ;;  %v1391_v26 = vld [vmem:[%s1844_s3 + $0xc4] ss:$8 sps:$4 sm:$0xff]  }
  0xff   :  { %v394_v32 = vpack.c.bf16 %v371_v30, %v370_v29  ;;  %v1396_v29 = vld [vmem:[%s1844_s3 + $0xd0] ss:$8 sps:$4 sm:$0xff]   ;;  %v1397_v30 = vld [vmem:[%s1844_s3 + $0xe4] ss:$8 sps:$4 sm:$0xff]  }
 0x101   :  { %v1308_v33 = vpop.f32.mrb[20].mxu0  ;;  %1150 = vmatprep.subr.bf16.mxu0 %v394_v32  ;;  %1318 = vmatprep.subr.bf16.mxu1 %v394_v32  ;;  %v1400_v32 = vld [vmem:[%s1844_s3 + $0xf4] ss:$8 sps:$4 sm:$0xff]  }
 0x102   :  { %v307_v36 = vpop.f32.mrb[21].mxu0  ;;  %1151 = vmatpush3.bf16.msra.mxu0 %v1548_v40  ;;  %1326 = vmatpush3.bf16.msra.mxu1 %v1548_v40  ;;  %v376_v38 = vmax.f32 %v1308_v33, 0.0  ;;  %v1402_v33 = vld [vmem:[%s1844_s3 + $0xf0] ss:$8 sps:$4 sm:$0xff]  }
 0x103   :  { %v1309_v37 = vpop.f32.mrb[22].mxu0  ;;  %1152 = vmatprep.subr.bf16.mxu0 %v395_v31  ;;  %1319 = vmatprep.subr.bf16.mxu1 %v395_v31  ;;  %v374_v43 = vmax.f32 %v307_v36, 0.0  ;;  %v1399_v31 = vld [vmem:[%s1844_s3 + $0xe0] ss:$8 sps:$4 sm:$0xff]   ;;  %v1733_v36 = vpop.permute.xlu0 %553 }
 0x104   :  { %v377_v41 = vmax.f32 %v1309_v37, 0.0  ;;  %v310_v42 = vpop.f32.mrb[23].mxu0  ;;  %v474_v37 = vpop.permute.xlu1 %473 }
 0x105   :  { %v375_v44 = vmax.f32 %v310_v42, 0.0 }
 0x106   :  { %v397_v47 = vpack.c.bf16 %v377_v41, %v376_v38  ;;  %1153 = vmatpush3.bf16.msra.mxu0 %v1546_v39  ;;  %1327 = vmatpush3.bf16.msra.mxu1 %v1546_v39 }
 0x107   :  { %v396_v40 = vpack.c.bf16 %v375_v44, %v374_v43  ;;  %v1735_v38 = vpop.permute.xlu0 %558 }
 0x108   :  { %v1737_v41 = vpop.permute.xlu1 %563 }
 0x109   :  { %v1312_v48 = vpop.f32.mrb[24].mxu0  ;;  %1154 = vmatprep.subr.bf16.mxu0 %v396_v40  ;;  %1320 = vmatprep.subr.bf16.mxu1 %v396_v40 }
 0x10a   :  { %v323_v50 = vpop.f32.mrb[25].mxu0  ;;  %1155 = vmatpush3.bf16.msra.mxu0 %v1564_v54  ;;  %1328 = vmatpush3.bf16.msra.mxu1 %v1564_v54  ;;  %v380_v52 = vmax.f32 %v1312_v48, 0.0 }
 0x10b   :  { %v1313_v51 = vpop.f32.mrb[26].mxu0  ;;  %1156 = vmatprep.subr.bf16.mxu0 %v397_v47  ;;  %1321 = vmatprep.subr.bf16.mxu1 %v397_v47  ;;  %v378_v56 = vmax.f32 %v323_v50, 0.0  ;;  %v1739_v42 = vpop.permute.xlu0 %478  ;;  %v1007_v50 = vunpack.c.l.s4 %v1404_v49 }
 0x10c   :  { %v381_v39 = vmax.f32 %v1313_v51, 0.0  ;;  %v326_v55 = vpop.f32.mrb[27].mxu0  ;;  %v1741_v43 = vpop.permute.xlu1 %483  ;;  %v1009_v51 = vlaneseq }
 0x10d   :  { %v379_v57 = vmax.f32 %v326_v55, 0.0  ;;  %v1758_v55 = vld.sshfl [vmem:[%s1846_s5] sm:$0x11 pattern:$0x75316420] }
 0x10e   :  { %v399_v58 = vpack.c.bf16 %v381_v39, %v380_v52  ;;  %1157 = vmatpush3.bf16.msra.mxu0 %v1562_v53  ;;  %1329 = vmatpush3.bf16.msra.mxu1 %v1562_v53  ;;  %v1008_v52 = vunpack.c.0.s8 %v1007_v50  ;;  %v1010_v39 = vshrl.u32 %v1009_v51, 7 }
 0x10f   :  { %v398_v59 = vpack.c.bf16 %v379_v57, %v378_v56  ;;  %v1743_v44 = vpop.permute.xlu0 %568 }
 0x110   :  { %v1745_v45 = vpop.permute.xlu1 %573 }
 0x111   :  { %v1316_v60 = vpop.f32.mrb[28].mxu0  ;;  %1158 = vmatprep.subr.bf16.mxu0 %v398_v59  ;;  %1322 = vmatprep.subr.bf16.mxu1 %v398_v59  ;;  %v1766_v59 = vsub.s32 %v1008_v52, %v1010_v39 }
 0x112   :  { %v339_v61 = vpop.f32.mrb[29].mxu0  ;;  %1159 = vmatpush3.bf16.msra.mxu0 %v1580_v4  ;;  %1330 = vmatpush3.bf16.msra.mxu1 %v1580_v4  ;;  %v384_v62 = vmax.f32 %v1316_v60, 0.0  ;;  %v1355_v4 = vld [vmem:[%s1844_s3] ss:$8 sps:$4 sm:$0xff]  }
 0x113   :  { %v1317_v54 = vpop.f32.mrb[30].mxu0  ;;  %1160 = vmatprep.subr.bf16.mxu0 %v399_v58  ;;  %1323 = vmatprep.subr.bf16.mxu1 %v399_v58  ;;  %v382_v1 = vmax.f32 %v339_v61, 0.0  ;;  %v1747_v46 = vpop.permute.xlu0 %488  ;;  %v1005_v58 = vcombine.high %v1758_v55, %v1758_v55  ;;  %v1012_v60 = vrot.slane %v1758_v55, %v1766_v59 }
 0x114   :  { %v385_v63 = vmax.f32 %v1317_v54, 0.0  ;;  %v342_v0 = vpop.f32.mrb[31].mxu0  ;;  %v1749_v47 = vpop.permute.xlu1 %493 }
 0x115   :  { %v383_v2 = vmax.f32 %v342_v0, 0.0  ;;  %v1019_v61 = vrot.slane %v1005_v58, %v1766_v59 }
 0x116   :  { %v401_v5 = vpack.c.bf16 %v385_v63, %v384_v62  ;;  %1161 = vmatpush3.bf16.msra.mxu0 %v1578_v3  ;;  %1331 = vmatpush3.bf16.msra.mxu1 %v1578_v3  ;;  %v1361_v3 = vld [vmem:[%s1844_s3 + $0x14] ss:$8 sps:$4 sm:$0xff]  }
 0x117   :  { %v400_v53 = vpack.c.bf16 %v383_v2, %v382_v1  ;;  %v1751_v40 = vpop.permute.xlu0 %578 }
 0x118   :  { %v1753_v48 = vpop.permute.xlu1 %583 }
 0x119   :  { %1162 = vmatprep.subr.bf16.mxu0 %v400_v53  ;;  %1324 = vmatprep.subr.bf16.mxu1 %v400_v53 }
 0x11a   :  { %1163 = vmatpush3.bf16.msra.mxu0 %v1596_v18  ;;  %1332 = vmatpush3.bf16.msra.mxu1 %v1596_v18  ;;  %v1379_v18 = vld [vmem:[%s1844_s3 + $0x44] ss:$8 sps:$4 sm:$0xff]  }
 0x11b   :  { %1164 = vmatprep.subr.bf16.mxu0 %v401_v5  ;;  %1325 = vmatprep.subr.bf16.mxu1 %v401_v5  ;;  %v1760_v56 = vpop.permute.xlu0 %498 }
 0x11c   :  { %v1762_v57 = vpop.permute.xlu1 %503 }
 0x11e   :  { %1165 = vmatpush3.bf16.msra.mxu0 %v1594_v17  ;;  %1333 = vmatpush3.bf16.msra.mxu1 %v1594_v17  ;;  %v1378_v17 = vld [vmem:[%s1844_s3 + $0x80] ss:$8 sps:$4 sm:$0xff]  }
 0x11f   :  { %v1771_v54 = vpop.permute.xlu0 %588 }
 0x120   :  { %v1773_v62 = vpop.permute.xlu1 %593 }
 0x121   :  { %819 = vmatmul.mubr.bf16.vlgmr.msra.gmra.mrb[32].mxu0 %v1355_v4  ;;  %859 = vmatmul.mubr.bf16.vlgmr.msra.gmra.mrb[0].mxu1 %v1358_v6 }
 0x122   :  { %826 = vmatprep.mubr.bf16.mxu0 %v1361_v3  ;;  %866 = vmatprep.mubr.bf16.mxu1 %v1363_v7 }
 0x123   :  { %v1775_v63 = vpop.permute.xlu0 %508 }
 0x124   :  { %v1777_v0 = vpop.permute.xlu1 %513 }
 0x127   :  { %v1779_v1 = vpop.permute.xlu0 %598 }
 0x128   :  { %v1781_v2 = vpop.permute.xlu1 %603 }
 0x129   :  { %827 = vmatmul.mubr.bf16.gmra.mrb[36].mxu0 %v1365_v8  ;;  %867 = vmatmul.mubr.bf16.gmra.mrb[4].mxu1 %v1366_v9 }
 0x12a   :  { %834 = vmatprep.mubr.bf16.mxu0 %v1367_v10  ;;  %874 = vmatprep.mubr.bf16.mxu1 %v1369_v11 }
 0x12b   :  { %v519_v5 = vpop.permute.xlu0 %518 }
 0x12c   :  { %v524_v53 = vpop.permute.xlu1 %523 }
 0x12f   :  { %v1783_v4 = vpop.permute.xlu0 %608 }
 0x130   :  { %v1785_v6 = vpop.permute.xlu1 %613 }
 0x131   :  { %835 = vmatmul.mubr.bf16.gmra.mrb[40].mxu0 %v1371_v12  ;;  %875 = vmatmul.mubr.bf16.gmra.mrb[8].mxu1 %v1372_v13 }
 0x132   :  { %842 = vmatprep.mubr.bf16.mxu0 %v1373_v14  ;;  %882 = vmatprep.mubr.bf16.mxu1 %v1375_v15 }
 0x133   :  { %v529_v3 = vpop.permute.xlu0 %528 }
 0x139   :  { %843 = vmatmul.mubr.bf16.gmra.mrb[44].mxu0 %v1377_v16  ;;  %883 = vmatmul.mubr.bf16.gmra.mrb[12].mxu1 %v1378_v17 }
 0x13a   :  { %850 = vmatprep.mubr.bf16.mxu0 %v1379_v18  ;;  %890 = vmatprep.mubr.bf16.mxu1 %v1381_v19 }
 0x141   :  { %851 = vmatmul.mubr.bf16.gmra.mrb[48].mxu0 %v1383_v20  ;;  %891 = vmatmul.mubr.bf16.gmra.mrb[16].mxu1 %v1384_v21 }
 0x142   :  { %898 = vmatprep.mubr.bf16.mxu1 %v1385_v22  ;;  %1054 = vmatprep.mubr.bf16.mxu0 %v1019_v61 }
 0x149   :  { %899 = vmatmul.mubr.bf16.gmra.mrb[20].mxu1 %v1387_v23 }
 0x14a   :  { %906 = vmatprep.mubr.bf16.mxu1 %v1388_v24 }
 0x151   :  { %907 = vmatmul.mubr.bf16.gmra.mrb[24].mxu1 %v1390_v25 }
 0x152   :  { %914 = vmatprep.mubr.bf16.mxu1 %v1391_v26 }
 0x159   :  { %915 = vmatmul.mubr.bf16.gmra.mrb[28].mxu1 %v1393_v27 }
 0x15a   :  { %922 = vmatprep.mubr.bf16.mxu1 %v1394_v28 }
 0x15d   :  { %v1787_v25 = vpop.permute.xlu0 %618 }
 0x15e   :  { %v534_v7 = vpop.permute.xlu1 %533 }
 0x161   :  { %923 = vmatmul.mubr.bf16.gmra.mrb[32].mxu1 %v1396_v29 }
 0x162   :  { %930 = vmatprep.mubr.bf16.mxu1 %v1397_v30 }
 0x164   :  { %v1789_v26 = vpop.permute.xlu1 %623 }
 0x169   :  { %931 = vmatmul.mubr.bf16.gmra.mrb[36].mxu1 %v1399_v31 }
 0x16a   :  { %938 = vmatprep.mubr.bf16.mxu1 %v1400_v32 }
 0x171   :  { %939 = vmatmul.mubr.bf16.gmra.mrb[40].mxu1 %v1402_v33 }
 0x1f4   :  { %v1196_v8 = vpop.f32.mrb[0].mxu1  ;;  %v1166_v9 = vpop.f32.mrb[32].mxu0 }
 0x1f5   :  { %v1197_v10 = vpop.f32.mrb[1].mxu1  ;;  %v1167_v11 = vpop.f32.mrb[33].mxu0 }
 0x1f6   :  { %v1198_v12 = vadd.f32 %v1197_v10, %v1196_v8  ;;  %v1199_v13 = vpop.f32.mrb[2].mxu1  ;;  %v1168_v14 = vadd.f32 %v1167_v11, %v1166_v9  ;;  %v1169_v15 = vpop.f32.mrb[34].mxu0 }
 0x1f7   :  { %v1200_v16 = vpop.f32.mrb[3].mxu1  ;;  %v1170_v17 = vpop.f32.mrb[35].mxu0 }
 0x1f8   :  { %v861_v18 = vadd.f32 %v1198_v12, %v519_v5  ;;  %v1201_v19 = vadd.f32 %v1200_v16, %v1199_v13  ;;  %v821_v20 = vadd.f32 %v1168_v14, %v469_v35  ;;  %v1171_v21 = vadd.f32 %v1170_v17, %v1169_v15  ;;  %v539_v12 = vpop.permute.xlu0 %538  ;;  %v544_v13 = vpop.permute.xlu1 %543 }
 0x1fa   :  { %v864_v22 = vadd.f32 %v1201_v19, %v524_v53  ;;  %v947_v23 = vmax.f32 %v821_v20, 0.0  ;;  %v824_v24 = vadd.f32 %v1171_v21, %v474_v37  ;;  %v957_v27 = vmax.f32 %v861_v18, 0.0 }
 0x1fc   :  { %v958_v28 = vmax.f32 %v864_v22, 0.0  ;;  %v1202_v29 = vpop.f32.mrb[4].mxu1  ;;  %v948_v30 = vmax.f32 %v824_v24, 0.0  ;;  %v1172_v31 = vpop.f32.mrb[36].mxu0 }
 0x1fd   :  { %v1203_v32 = vpop.f32.mrb[5].mxu1  ;;  %v1173_v33 = vpop.f32.mrb[37].mxu0 }
 0x1fe   :  { %v1791_v49 = vpack.c.bf16 %v958_v28, %v957_v27  ;;  %v1204_v50 = vadd.f32 %v1203_v32, %v1202_v29  ;;  %v1205_v51 = vpop.f32.mrb[6].mxu1  ;;  %v1793_v35 = vpack.c.bf16 %v948_v30, %v947_v23  ;;  %v1174_v52 = vadd.f32 %v1173_v33, %v1172_v31  ;;  %v1175_v39 = vpop.f32.mrb[38].mxu0 }
 0x1ff   :  { %v1206_v37 = vpop.f32.mrb[7].mxu1  ;;  %v1176_v58 = vpop.f32.mrb[39].mxu0 }
 0x200   :  { %v869_v61 = vadd.f32 %v1204_v50, %v529_v3  ;;  %v1207_v5 = vadd.f32 %v1206_v37, %v1205_v51  ;;  %v829_v53 = vadd.f32 %v1174_v52, %v1739_v42  ;;  %v1177_v8 = vadd.f32 %v1176_v58, %v1175_v39 }
 0x202   :  { %v872_v9 = vadd.f32 %v1207_v5, %v534_v7  ;;  %v949_v10 = vmax.f32 %v829_v53, 0.0  ;;  %v832_v11 = vadd.f32 %v1177_v8, %v1741_v43  ;;  %v959_v14 = vmax.f32 %v869_v61, 0.0 }
 0x204   :  { %v960_v15 = vmax.f32 %v872_v9, 0.0  ;;  %v1208_v16 = vpop.f32.mrb[8].mxu1  ;;  %v950_v17 = vmax.f32 %v832_v11, 0.0  ;;  %v1178_v18 = vpop.f32.mrb[40].mxu0 }
 0x205   :  { %v1209_v19 = vpop.f32.mrb[9].mxu1  ;;  %v1179_v20 = vpop.f32.mrb[41].mxu0 }
 0x206   :  { %v1797_v21 = vpack.c.bf16 %v960_v15, %v959_v14  ;;  %v1210_v3 = vadd.f32 %v1209_v19, %v1208_v16  ;;  %v1211_v22 = vpop.f32.mrb[10].mxu1  ;;  %v1799_v23 = vpack.c.bf16 %v950_v17, %v949_v10  ;;  %v1180_v42 = vadd.f32 %v1179_v20, %v1178_v18  ;;  %v1181_v7 = vpop.f32.mrb[42].mxu0 }
 0x207   :  { %v1212_v24 = vpop.f32.mrb[11].mxu1  ;;  %v1182_v27 = vpop.f32.mrb[43].mxu0 }
 0x208   :  { %v877_v43 = vadd.f32 %v1210_v3, %v539_v12  ;;  %v1213_v28 = vadd.f32 %v1212_v24, %v1211_v22  ;;  %v837_v29 = vadd.f32 %v1180_v42, %v1747_v46  ;;  %v1183_v30 = vadd.f32 %v1182_v27, %v1181_v7 }
 0x20a   :  { %v880_v31 = vadd.f32 %v1213_v28, %v544_v13  ;;  %v951_v32 = vmax.f32 %v837_v29, 0.0  ;;  %v840_v33 = vadd.f32 %v1183_v30, %v1749_v47  ;;  %v961_v50 = vmax.f32 %v877_v43, 0.0 }
 0x20c   :  { %v962_v51 = vmax.f32 %v880_v31, 0.0  ;;  %v952_v52 = vmax.f32 %v840_v33, 0.0  ;;  %v1184_v39 = vpop.f32.mrb[44].mxu0  ;;  %v1214_v37 = vpop.f32.mrb[12].mxu1 }
 0x20d   :  { %v1185_v58 = vpop.f32.mrb[45].mxu0  ;;  %v1215_v61 = vpop.f32.mrb[13].mxu1 }
 0x20e   :  { %v1803_v5 = vpack.c.bf16 %v962_v51, %v961_v50  ;;  %v1805_v53 = vpack.c.bf16 %v952_v52, %v951_v32  ;;  %v1186_v8 = vadd.f32 %v1185_v58, %v1184_v39  ;;  %v1216_v9 = vadd.f32 %v1215_v61, %v1214_v37  ;;  %v1187_v10 = vpop.f32.mrb[46].mxu0  ;;  %v1217_v46 = vpop.f32.mrb[14].mxu1 }
 0x20f   :  { %v1188_v11 = vpop.f32.mrb[47].mxu0  ;;  %v1218_v12 = vpop.f32.mrb[15].mxu1 }
 0x210   :  { %v845_v13 = vadd.f32 %v1186_v8, %v1760_v56  ;;  %v885_v47 = vadd.f32 %v1216_v9, %v1731_v34  ;;  %v1189_v14 = vadd.f32 %v1188_v11, %v1187_v10  ;;  %v1219_v15 = vadd.f32 %v1218_v12, %v1217_v46 }
 0x212   :  { %v848_v16 = vadd.f32 %v1189_v14, %v1762_v57  ;;  %v888_v17 = vadd.f32 %v1219_v15, %v1733_v36  ;;  %v953_v18 = vmax.f32 %v845_v13, 0.0  ;;  %v963_v19 = vmax.f32 %v885_v47, 0.0 }
 0x214   :  { %v954_v20 = vmax.f32 %v848_v16, 0.0  ;;  %v964_v3 = vmax.f32 %v888_v17, 0.0  ;;  %v1190_v22 = vpop.f32.mrb[48].mxu0  ;;  %v1220_v42 = vpop.f32.mrb[16].mxu1 }
 0x215   :  { %v1191_v7 = vpop.f32.mrb[49].mxu0  ;;  %v1221_v24 = vpop.f32.mrb[17].mxu1 }
 0x216   :  { %v982_v27 = vpack.c.bf16 %v954_v20, %v953_v18  ;;  %v1192_v43 = vadd.f32 %v1191_v7, %v1190_v22  ;;  %v1222_v28 = vadd.f32 %v1221_v24, %v1220_v42  ;;  %v1193_v56 = vpop.f32.mrb[50].mxu0  ;;  %v1223_v29 = vpop.f32.mrb[18].mxu1  ;;  %v987_v34 = vpack.c.bf16 %v964_v3, %v963_v19 }
 0x217   :  { %v1194_v30 = vpop.f32.mrb[51].mxu0  ;;  %v1224_v31 = vpop.f32.mrb[19].mxu1 }
 0x218   :  { %v853_v57 = vadd.f32 %v1192_v43, %v1775_v63  ;;  %v893_v36 = vadd.f32 %v1222_v28, %v1735_v38  ;;  %v1195_v32 = vadd.f32 %v1194_v30, %v1193_v56  ;;  %v1225_v33 = vadd.f32 %v1224_v31, %v1223_v29  ;;  %1262 = vmatprep.subr.bf16.mxu0 %v987_v34 }
 0x219   :  { %1263 = vmatpush3.bf16.msra.mxu0 %v1793_v35 }
 0x21a   :  { %v856_v50 = vadd.f32 %v1195_v32, %v1777_v0  ;;  %v896_v51 = vadd.f32 %v1225_v33, %v1737_v41  ;;  %v955_v52 = vmax.f32 %v853_v57, 0.0  ;;  %v965_v39 = vmax.f32 %v893_v36, 0.0 }
 0x21c   :  { %v956_v37 = vmax.f32 %v856_v50, 0.0  ;;  %v966_v58 = vmax.f32 %v896_v51, 0.0  ;;  %v1226_v61 = vpop.f32.mrb[20].mxu1 }
 0x21d   :  { %v1227_v8 = vpop.f32.mrb[21].mxu1 }
 0x21e   :  { %v983_v9 = vpack.c.bf16 %v956_v37, %v955_v52  ;;  %v1228_v10 = vadd.f32 %v1227_v8, %v1226_v61  ;;  %v1229_v63 = vpop.f32.mrb[22].mxu1  ;;  %v988_v46 = vpack.c.bf16 %v966_v58, %v965_v39 }
 0x21f   :  { %v1230_v38 = vpop.f32.mrb[23].mxu1 }
 0x220   :  { %v901_v11 = vadd.f32 %v1228_v10, %v1743_v44  ;;  %v1231_v12 = vadd.f32 %v1230_v38, %v1229_v63  ;;  %1264 = vmatprep.subr.bf16.mxu0 %v988_v46 }
 0x221   :  { %1265 = vmatpush3.bf16.msra.mxu0 %v1799_v23 }
 0x222   :  { %v904_v0 = vadd.f32 %v1231_v12, %v1745_v45  ;;  %v967_v41 = vmax.f32 %v901_v11, 0.0 }
 0x224   :  { %v968_v35 = vmax.f32 %v904_v0, 0.0  ;;  %v1232_v13 = vpop.f32.mrb[24].mxu1 }
 0x225   :  { %v1233_v47 = vpop.f32.mrb[25].mxu1 }
 0x226   :  { %v1234_v14 = vadd.f32 %v1233_v47, %v1232_v13  ;;  %v1235_v15 = vpop.f32.mrb[26].mxu1  ;;  %v989_v16 = vpack.c.bf16 %v968_v35, %v967_v41 }
 0x227   :  { %v1236_v17 = vpop.f32.mrb[27].mxu1 }
 0x228   :  { %v909_v18 = vadd.f32 %v1234_v14, %v1751_v40  ;;  %v1237_v19 = vadd.f32 %v1236_v17, %v1235_v15  ;;  %1266 = vmatprep.subr.bf16.mxu0 %v989_v16 }
 0x229   :  { %1267 = vmatpush3.bf16.msra.mxu0 %v1805_v53 }
 0x22a   :  { %v912_v44 = vadd.f32 %v1237_v19, %v1753_v48  ;;  %v969_v20 = vmax.f32 %v909_v18, 0.0 }
 0x22c   :  { %v970_v23 = vmax.f32 %v912_v44, 0.0  ;;  %v1238_v3 = vpop.f32.mrb[28].mxu1 }
 0x22d   :  { %v1239_v45 = vpop.f32.mrb[29].mxu1 }
 0x22e   :  { %v1240_v22 = vadd.f32 %v1239_v45, %v1238_v3  ;;  %v1241_v42 = vpop.f32.mrb[30].mxu1  ;;  %v990_v7 = vpack.c.bf16 %v970_v23, %v969_v20 }
 0x22f   :  { %v1242_v24 = vpop.f32.mrb[31].mxu1 }
 0x230   :  { %v917_v43 = vadd.f32 %v1240_v22, %v1771_v54  ;;  %v1243_v28 = vadd.f32 %v1242_v24, %v1241_v42  ;;  %1268 = vmatprep.subr.bf16.mxu0 %v990_v7 }
 0x231   :  { %1269 = vmatpush3.bf16.msra.mxu0 %v982_v27 }
 0x232   :  { %v920_v40 = vadd.f32 %v1243_v28, %v1773_v62  ;;  %v971_v56 = vmax.f32 %v917_v43, 0.0 }
 0x234   :  { %v972_v29 = vmax.f32 %v920_v40, 0.0  ;;  %v1244_v53 = vpop.f32.mrb[32].mxu1 }
 0x235   :  { %v1245_v34 = vpop.f32.mrb[33].mxu1 }
 0x236   :  { %v1246_v48 = vadd.f32 %v1245_v34, %v1244_v53  ;;  %v1247_v30 = vpop.f32.mrb[34].mxu1  ;;  %v991_v31 = vpack.c.bf16 %v972_v29, %v971_v56 }
 0x237   :  { %v1248_v57 = vpop.f32.mrb[35].mxu1 }
 0x238   :  { %v925_v36 = vadd.f32 %v1246_v48, %v1779_v1  ;;  %v1249_v32 = vadd.f32 %v1248_v57, %v1247_v30  ;;  %1270 = vmatprep.subr.bf16.mxu0 %v991_v31 }
 0x239   :  { %1271 = vmatpush3.bf16.msra.mxu0 %v983_v9 }
 0x23a   :  { %v928_v54 = vadd.f32 %v1249_v32, %v1781_v2  ;;  %v973_v33 = vmax.f32 %v925_v36, 0.0 }
 0x23c   :  { %v974_v50 = vmax.f32 %v928_v54, 0.0  ;;  %v1250_v27 = vpop.f32.mrb[36].mxu1 }
 0x23d   :  { %v1251_v51 = vpop.f32.mrb[37].mxu1 }
 0x23e   :  { %v1252_v62 = vadd.f32 %v1251_v51, %v1250_v27  ;;  %v1253_v52 = vpop.f32.mrb[38].mxu1  ;;  %v992_v39 = vpack.c.bf16 %v974_v50, %v973_v33 }
 0x23f   :  { %v1254_v37 = vpop.f32.mrb[39].mxu1 }
 0x240   :  { %v933_v58 = vadd.f32 %v1252_v62, %v1783_v4  ;;  %v1255_v61 = vadd.f32 %v1254_v37, %v1253_v52  ;;  %1272 = vmatprep.subr.bf16.mxu0 %v992_v39 }
 0x241   :  { %1273 = vmatpush3.bf16.msra.mxu0 %v1791_v49 }
 0x242   :  { %v936_v1 = vadd.f32 %v1255_v61, %v1785_v6  ;;  %v975_v8 = vmax.f32 %v933_v58, 0.0 }
 0x244   :  { %v976_v9 = vmax.f32 %v936_v1, 0.0  ;;  %v1256_v10 = vpop.f32.mrb[40].mxu1 }
 0x245   :  { %v1257_v2 = vpop.f32.mrb[41].mxu1 }
 0x246   :  { %v1258_v63 = vadd.f32 %v1257_v2, %v1256_v10  ;;  %v1259_v46 = vpop.f32.mrb[42].mxu1  ;;  %v993_v38 = vpack.c.bf16 %v976_v9, %v975_v8 }
 0x247   :  { %v1260_v11 = vpop.f32.mrb[43].mxu1 }
 0x248   :  { %v941_v12 = vadd.f32 %v1258_v63, %v1787_v25  ;;  %v1261_v0 = vadd.f32 %v1260_v11, %v1259_v46  ;;  %1274 = vmatprep.subr.bf16.mxu0 %v993_v38  ;;  %v996_v25 = vld [vmem:[%s1847_s1] sm:$0x1] }
 0x249   :  { %1275 = vmatpush3.bf16.msra.mxu0 %v1797_v21 }
 0x24a   :  { %v944_v4 = vadd.f32 %v1261_v0, %v1789_v26  ;;  %v977_v41 = vmax.f32 %v941_v12, 0.0 }
 0x24c   :  { %v978_v49 = vmax.f32 %v944_v4, 0.0 }
 0x24e   :  { %v994_v35 = vpack.c.bf16 %v978_v49, %v977_v41 }
 0x250   :  { %1276 = vmatprep.subr.bf16.mxu0 %v994_v35 }
 0x251   :  { %1277 = vmatpush3.bf16.msra.mxu0 %v1803_v5 }
 0x254   :  { %1055 = vmatmul.mubr.bf16.vlgmr.msra.gmra.mrb[52].mxu0 %v1012_v60 }
 0x327   :  { %v1278_v6 = vpop.f32.mrb[52].mxu0 }
 0x328   :  { %v1279_v13 = vpop.f32.mrb[53].mxu0 }
 0x329   :  { %v1280_v47 = vadd.f32 %v1279_v13, %v1278_v6  ;;  %v1281_v21 = vpop.f32.mrb[54].mxu0 }
 0x32a   :  { %v1282_v14 = vpop.f32.mrb[55].mxu0 }
 0x32b   :  { %v1057_v26 = vadd.f32 %v1280_v47, %v996_v25 }
 0x32d   :  { %1062 = vst [vmem:[%s1848_s6] sm:$0x1] %v1057_v26 }

</bundles_post_ra>
